<compile_context>
chip_gen: v7x
topology: tpu7x:2x2x1
jax: 0.10.0
libtpu: 0.0.40
codegen_flags: <defaults>
</compile_context>

<pallas_src>
import functools

import jax
import jax.numpy as jnp
from jax.experimental import pallas as pl
from jax.experimental.pallas import tpu as pltpu


def _mlp_kernel(n_layers, *refs):
    """Fused MLP forward on one batch tile (batch on lanes).

    refs = (xT_ref, w0, b0, w1, b1, ..., w_last, b_last, o_ref)

      xT_ref : (input_size, TB)   f32, batch on lanes
      wi     : (out_i, in_i)      bf16  (hidden layers, MXU operands)
      bi     : (out_i, 1)         f32
      w_last : (hidden_last, 1)   f32   (folded into VPU mul + sublane reduce)
      b_last : (1, 1)             f32
      o_ref  : (1, TB)            f32, lane-dense output row
    """
    x_ref = refs[0]
    o_ref = refs[-1]
    p = refs[1:-1]

    h = x_ref[...].astype(jnp.float32)                       # (in, TB)

    # Hidden layers: bf16 MXU matmul, f32 accumulate, f32 bias + ReLU on the VPU.
    for li in range(n_layers - 1):
        w_ref = p[2 * li]                                    # (out, in) bf16
        b_ref = p[2 * li + 1]                                # (out, 1)  f32
        z = jnp.dot(w_ref[...], h.astype(jnp.bfloat16),
                    preferred_element_type=jnp.float32)      # (out, TB) f32
        h = jnp.maximum(z + b_ref[...], 0.0)

    # Final Linear(hidden -> 1): VPU multiply + sublane reduce (no N=1 MXU matmul),
    # result is already lane-dense (1, TB).
    w_ref = p[2 * (n_layers - 1)]                            # (hidden_last, 1) f32
    b_ref = p[2 * (n_layers - 1) + 1]                        # (1, 1) f32
    z = jnp.sum(h * w_ref[...], axis=0, keepdims=True) + b_ref[...]   # (1, TB)

    # sigmoid(z) = 1 / (1 + exp(-z)): EUP exp + EUP approx reciprocal (frees the VALU).
    o_ref[...] = pl.reciprocal(1.0 + jnp.exp(-z), approx=True).astype(o_ref.dtype)


def _round_up(x, m):
    return (x + m - 1) // m * m


def mlp1_forward(x, params, *, tb=512, interpret=False):
    """Run the fused MLP1 kernel.

    x      : (B, input_size) f32
    params : list of (W, b) in PyTorch nn.Linear layout: W (out, in), b (out,).
             The last layer must have out == 1.
    returns (B, 1) f32
    """
    n_layers = len(params)
    B, in_size = x.shape

    # Batch tile: multiple of 128 (lane-dense), capped at `tb`; pad batch to a multiple.
    tb = max(128, min(_round_up(tb, 128), _round_up(B, 128)))
    b_pad = _round_up(B, tb)
    num_tiles = b_pad // tb

    # Present x transposed (batch on lanes), padded out to b_pad columns.
    x_t = jnp.zeros((in_size, b_pad), jnp.float32).at[:, :B].set(x.T)

    flat_args = [x_t]
    in_specs = [pl.BlockSpec((in_size, tb), lambda i: (0, i))]

    for li, (w, b) in enumerate(params):
        if li < n_layers - 1:
            w_k = w.astype(jnp.bfloat16)                    # (out, in), MXU operand
            b_k = b.reshape(-1, 1).astype(jnp.float32)      # (out, 1)
        else:
            # Final Linear(hidden -> 1): keep as an f32 column for VPU mul + sublane reduce.
            w_k = w.T.astype(jnp.float32)                   # (hidden_last, 1)
            b_k = b.reshape(1, 1).astype(jnp.float32)       # (1, 1)
        flat_args += [w_k, b_k]
        # Full-array blocks with constant index_map -> VMEM-resident across all batch tiles.
        in_specs += [pl.BlockSpec(w_k.shape, lambda i: (0, 0)),
                     pl.BlockSpec(b_k.shape, lambda i: (0, 0))]

    out = pl.pallas_call(
        functools.partial(_mlp_kernel, n_layers),
        out_shape=jax.ShapeDtypeStruct((1, b_pad), jnp.float32),
        grid_spec=pltpu.PrefetchScalarGridSpec(
            num_scalar_prefetch=0,
            grid=(num_tiles,),
            in_specs=in_specs,
            out_specs=pl.BlockSpec((1, tb), lambda i: (0, i)),
        ),
        compiler_params=pltpu.CompilerParams(
            dimension_semantics=("parallel",),
            vmem_limit_bytes=32 * 1024 * 1024,
        ),
        interpret=interpret,
    )(*flat_args)

    return out[0, :B].reshape(B, 1)


def init_params(key, input_size, hidden_layers):
    """Deterministic init matching MLP1's layers, in PyTorch nn.Linear layout.

    Returns list of (W[out, in], b[out]) including the final Linear(hidden_last -> 1).
    """
    sizes = [input_size] + list(hidden_layers) + [1]
    params = []
    for i in range(len(sizes) - 1):
        fan_in, fan_out = sizes[i], sizes[i + 1]
        key, kw, kb = jax.random.split(key, 3)
        bound = 1.0 / jnp.sqrt(fan_in)
        w = jax.random.uniform(kw, (fan_out, fan_in), jnp.float32, -bound, bound)
        b = jax.random.uniform(kb, (fan_out,), jnp.float32, -bound, bound)
        params.append((w, b))
    return params


def reference_forward(x, params):
    """Pure-JAX f32 reference with PyTorch Linear semantics: y = x @ W.T + b."""
    h = x
    n = len(params)
    for i, (w, b) in enumerate(params):
        z = h @ w.T + b
        h = jnp.maximum(z, 0.0) if i < n - 1 else jax.nn.sigmoid(z)
    return h


if __name__ == "__main__":
    MLP1_HIDDEN_LAYERS = [64, 32]
    input_size = 32

    key = jax.random.PRNGKey(0)
    key, kp = jax.random.split(key)
    params = init_params(kp, input_size, MLP1_HIDDEN_LAYERS)

    # Test 1: tiny batch (single padded tile of 128 lanes).
    key, kx = jax.random.split(key)
    x_small = jax.random.normal(kx, (8, input_size), jnp.float32)
    out_small = jax.block_until_ready(mlp1_forward(x_small, params))
    ref_small = reference_forward(x_small, params)
    assert out_small.shape == (8, 1), out_small.shape
    # bf16 MXU operands -> loosened tolerance vs the f32 reference.
    assert jnp.allclose(out_small, ref_small, atol=2e-2, rtol=2e-2), "mismatch (small batch)"

    # Test 2: exercises multiple grid tiles + batch padding (300 rows -> 3 tiles of 128).
    key, kx2 = jax.random.split(key)
    x_big = jax.random.normal(kx2, (300, input_size), jnp.float32)
    out_big = jax.block_until_ready(mlp1_forward(x_big, params, tb=128))
    ref_big = reference_forward(x_big, params)
    assert out_big.shape == (300, 1), out_big.shape
    assert jnp.allclose(out_big, ref_big, atol=2e-2, rtol=2e-2), "mismatch (tiled batch)"

    print("KERNEL_OK")
</pallas_src>

<mosaic_0001>
module attributes {stable_mosaic.version = 11 : i64} {
  func.func @_mlp_kernel(%arg0: i32, %arg1: memref<32x128xf32, #tpu.memory_space<vmem>>, %arg2: memref<64x32xbf16, #tpu.memory_space<vmem>>, %arg3: memref<64x1xf32, #tpu.memory_space<vmem>>, %arg4: memref<32x64xbf16, #tpu.memory_space<vmem>>, %arg5: memref<32x1xf32, #tpu.memory_space<vmem>>, %arg6: memref<32x1xf32, #tpu.memory_space<vmem>>, %arg7: memref<1x1xf32, #tpu.memory_space<vmem>>, %arg8: memref<1x128xf32, #tpu.memory_space<vmem>>) attributes {dimension_semantics = [#tpu.dimension_semantics<parallel>], iteration_bounds = array<i64: 1>, scalar_prefetch = 0 : i64, scratch_operands = 0 : i64, tpu.core_type = #tpu.core_type<tc>, window_params = [{transform_indices = @transform_0, window_bounds = array<i64: 32, 128>}, {pipeline_mode = #tpu.pipeline_mode<synchronous>, transform_indices = @transform_1, window_bounds = array<i64: 64, 32>}, {pipeline_mode = #tpu.pipeline_mode<synchronous>, transform_indices = @transform_2, window_bounds = array<i64: 64, 1>}, {pipeline_mode = #tpu.pipeline_mode<synchronous>, transform_indices = @transform_3, window_bounds = array<i64: 32, 64>}, {pipeline_mode = #tpu.pipeline_mode<synchronous>, transform_indices = @transform_4, window_bounds = array<i64: 32, 1>}, {pipeline_mode = #tpu.pipeline_mode<synchronous>, transform_indices = @transform_5, window_bounds = array<i64: 32, 1>}, {pipeline_mode = #tpu.pipeline_mode<synchronous>, transform_indices = @transform_6, window_bounds = array<i64: 1, 1>}, {transform_indices = @transform_7, window_bounds = array<i64: 1, 128>}]} {
    %c0 = arith.constant 0 : index
    %c0_0 = arith.constant 0 : index
    %0 = vector.load %arg1[%c0, %c0_0] : memref<32x128xf32, #tpu.memory_space<vmem>>, vector<32x128xf32>
    %c0_1 = arith.constant 0 : index
    %c0_2 = arith.constant 0 : index
    %1 = vector.load %arg2[%c0_1, %c0_2] : memref<64x32xbf16, #tpu.memory_space<vmem>>, vector<64x32xbf16>
    %2 = arith.truncf %0 : vector<32x128xf32> to vector<32x128xbf16>
    %cst = arith.constant dense<0.000000e+00> : vector<64x128xf32>
    %3 = tpu.matmul %1, %2, %cst {dimension_numbers = #tpu.dot_dimension_numbers<[1], [0], [0], [1], [0, 0, 1, 1], [], []>} : vector<64x32xbf16>, vector<32x128xbf16>, vector<64x128xf32> -> vector<64x128xf32>
    %c0_3 = arith.constant 0 : index
    %c0_4 = arith.constant 0 : index
    %4 = vector.load %arg3[%c0_3, %c0_4] : memref<64x1xf32, #tpu.memory_space<vmem>>, vector<64x1xf32>
    %5 = vector.broadcast %4 : vector<64x1xf32> to vector<64x128xf32>
    %6 = arith.addf %3, %5 : vector<64x128xf32>
    %cst_5 = arith.constant 0.000000e+00 : f32
    %7 = vector.broadcast %cst_5 : f32 to vector<64x128xf32>
    %8 = arith.maximumf %6, %7 : vector<64x128xf32>
    %c0_6 = arith.constant 0 : index
    %c0_7 = arith.constant 0 : index
    %9 = vector.load %arg4[%c0_6, %c0_7] : memref<32x64xbf16, #tpu.memory_space<vmem>>, vector<32x64xbf16>
    %10 = arith.truncf %8 : vector<64x128xf32> to vector<64x128xbf16>
    %cst_8 = arith.constant dense<0.000000e+00> : vector<32x128xf32>
    %11 = tpu.matmul %9, %10, %cst_8 {dimension_numbers = #tpu.dot_dimension_numbers<[1], [0], [0], [1], [0, 0, 1, 1], [], []>} : vector<32x64xbf16>, vector<64x128xbf16>, vector<32x128xf32> -> vector<32x128xf32>
    %c0_9 = arith.constant 0 : index
    %c0_10 = arith.constant 0 : index
    %12 = vector.load %arg5[%c0_9, %c0_10] : memref<32x1xf32, #tpu.memory_space<vmem>>, vector<32x1xf32>
    %13 = vector.broadcast %12 : vector<32x1xf32> to vector<32x128xf32>
    %14 = arith.addf %11, %13 : vector<32x128xf32>
    %cst_11 = arith.constant 0.000000e+00 : f32
    %15 = vector.broadcast %cst_11 : f32 to vector<32x128xf32>
    %16 = arith.maximumf %14, %15 : vector<32x128xf32>
    %c0_12 = arith.constant 0 : index
    %c0_13 = arith.constant 0 : index
    %17 = vector.load %arg6[%c0_12, %c0_13] : memref<32x1xf32, #tpu.memory_space<vmem>>, vector<32x1xf32>
    %18 = vector.broadcast %17 : vector<32x1xf32> to vector<32x128xf32>
    %19 = arith.mulf %16, %18 : vector<32x128xf32>
    %cst_14 = arith.constant dense<0.000000e+00> : vector<128xf32>
    %20 = vector.multi_reduction <add>, %19, %cst_14 [0] : vector<32x128xf32> to vector<128xf32>
    %21 = vector.shape_cast %20 : vector<128xf32> to vector<1x128xf32>
    %c0_15 = arith.constant 0 : index
    %c0_16 = arith.constant 0 : index
    %22 = vector.load %arg7[%c0_15, %c0_16] : memref<1x1xf32, #tpu.memory_space<vmem>>, vector<1x1xf32>
    %23 = vector.broadcast %22 : vector<1x1xf32> to vector<1x128xf32>
    %24 = arith.addf %21, %23 : vector<1x128xf32>
    %cst_17 = arith.constant 0.000000e+00 : f32
    %25 = vector.broadcast %cst_17 : f32 to vector<1x128xf32>
    %26 = arith.subf %25, %24 : vector<1x128xf32>
    %27 = math.exp %26 : vector<1x128xf32>
    %cst_18 = arith.constant 1.000000e+00 : f32
    %28 = vector.broadcast %cst_18 : f32 to vector<1x128xf32>
    %29 = arith.addf %28, %27 : vector<1x128xf32>
    %30 = tpu.reciprocal %29 {approx = true} : vector<1x128xf32> -> vector<1x128xf32>
    %c0_19 = arith.constant 0 : index
    %c0_20 = arith.constant 0 : index
    %31 = vector.load %arg8[%c0_19, %c0_20] : memref<1x128xf32, #tpu.memory_space<vmem>>, vector<1x128xf32>
    tpu.vector_store %arg8[%c0_19, %c0_20], %30 {strides = array<i32>} : memref<1x128xf32, #tpu.memory_space<vmem>>, vector<1x128xf32>,
    return
  }
  func.func @transform_0(%arg0: i32) -> (i32, i32) {
    %c0_i32 = arith.constant 0 : i32
    %c0_i32_0 = arith.constant 0 : i32
    return %c0_i32, %arg0 : i32, i32
  }
  func.func @transform_1(%arg0: i32) -> (i32, i32) {
    %c0_i32 = arith.constant 0 : i32
    %c0_i32_0 = arith.constant 0 : i32
    %c0_i32_1 = arith.constant 0 : i32
    return %c0_i32, %c0_i32_0 : i32, i32
  }
  func.func @transform_2(%arg0: i32) -> (i32, i32) {
    %c0_i32 = arith.constant 0 : i32
    %c0_i32_0 = arith.constant 0 : i32
    %c0_i32_1 = arith.constant 0 : i32
    return %c0_i32, %c0_i32_0 : i32, i32
  }
  func.func @transform_3(%arg0: i32) -> (i32, i32) {
    %c0_i32 = arith.constant 0 : i32
    %c0_i32_0 = arith.constant 0 : i32
    %c0_i32_1 = arith.constant 0 : i32
    return %c0_i32, %c0_i32_0 : i32, i32
  }
  func.func @transform_4(%arg0: i32) -> (i32, i32) {
    %c0_i32 = arith.constant 0 : i32
    %c0_i32_0 = arith.constant 0 : i32
    %c0_i32_1 = arith.constant 0 : i32
    return %c0_i32, %c0_i32_0 : i32, i32
  }
  func.func @transform_5(%arg0: i32) -> (i32, i32) {
    %c0_i32 = arith.constant 0 : i32
    %c0_i32_0 = arith.constant 0 : i32
    %c0_i32_1 = arith.constant 0 : i32
    return %c0_i32, %c0_i32_0 : i32, i32
  }
  func.func @transform_6(%arg0: i32) -> (i32, i32) {
    %c0_i32 = arith.constant 0 : i32
    %c0_i32_0 = arith.constant 0 : i32
    %c0_i32_1 = arith.constant 0 : i32
    return %c0_i32, %c0_i32_0 : i32, i32
  }
  func.func @transform_7(%arg0: i32) -> (i32, i32) {
    %c0_i32 = arith.constant 0 : i32
    %c0_i32_0 = arith.constant 0 : i32
    return %c0_i32, %arg0 : i32, i32
  }
}

</mosaic_0001>

<bundles_post_ra>
// kernel: tpu_custom_call.1
= control target key start
LH: loop header
LB: loop body
LE: loop exit
PB: predicated region body
PF: predicated region fallthrough
CT: control target
= control target key end

     0   :  { %s595_s0 = inlined_call_operand.vmem [shape: f32[32,128], index: 0, kind: input, shape index: {}]   ;;  %s596_s1 = inlined_call_operand.vmem [shape: bf16[64,32], index: 1, kind: input, shape index: {}]   ;;  %s597_s2 = inlined_call_operand.vmem [shape: f32[64,1], index: 2, kind: input, shape index: {}]   ;;  %s598_s3 = inlined_call_operand.vmem [shape: bf16[32,64], index: 3, kind: input, shape index: {}]   ;;  %s599_s4 = inlined_call_operand.vmem [shape: f32[32,1], index: 4, kind: input, shape index: {}]   ;;  %s600_s5 = inlined_call_operand.vmem [shape: f32[32,1], index: 5, kind: input, shape index: {}]   ;;  %s601_s6 = inlined_call_operand.<no memory space> [shape: f32[1,1], index: 6, kind: input, shape index: {}]   ;;  %s602_s7 = inlined_call_operand.hbm [shape: f32[1,128], index: 7, kind: output, shape index: {}]  }
   0x1   :  { %v12_v0 = vstv %s601_s6 }
   0x2   :  { %13 = vst [vmem:[#allocation2] sm:$0x1] %v12_v0 }
   0x3   :  { %v30_v1 = vld [vmem:[%s595_s0] sm:$0xff]  ;;  %v31_v2 = vld [vmem:[%s595_s0 + $0x8] sm:$0xff]  ;;  %v32_v3 = vld [vmem:[%s595_s0 + $0x10] sm:$0xff]  ;;  %vm112_vm0 = vcmask 261120   ;;  %v454_v6 = vmov 0  }
   0x4   :  { %v42_v4 = vpack.c.bf16 %v31_v2, %v30_v1  ;;  %v33_v5 = vld [vmem:[%s595_s0 + $0x18] sm:$0xff]  ;;  %418 = vset.pattern.permute.xlu0 %v454_v6  ;;  %419 = vset.pattern.permute.xlu1 %v454_v6  ;;  %v420_v8 = vld [vmem:[%s596_s1] sm:$0xff]   ;;  %v46_v10 = vld [vmem:[%s597_s2 + $0x10] sm:$0xff] }
   0x5   :  { %v43_v7 = vpack.c.bf16 %v33_v5, %v32_v3  ;;  %396 = vmatprep.mubr.msk.bf16.mxu0 %vm112_vm0, %v420_v8  ;;  %v44_v9 = vld [vmem:[%s597_s2] sm:$0xff]  ;;  %v421_v11 = vld [vmem:[%s596_s1 + $0x8] sm:$0xff]   ;;  %64 = vperm.xlu1 %419, %v46_v10   ;;  %v422_v13 = vld [vmem:[%s596_s1 + $0x10] sm:$0xff]  }
   0x6   :  { %392 = vmatprep.subr.bf16.mxu0 %v42_v4  ;;  %54 = vperm.xlu0 %418, %v44_v9   ;;  %v45_v12 = vld [vmem:[%s597_s2 + $0x8] sm:$0xff]  ;;  %v47_v14 = vld [vmem:[%s597_s2 + $0x18] sm:$0xff]  ;;  %v48_v15 = vld [vmem:[%s597_s2 + $0x20] sm:$0xff] }
   0x7   :  { %393 = vmatpush3.bf16.msra.mxu0 %v42_v4  ;;  %v49_v16 = vld [vmem:[%s597_s2 + $0x28] sm:$0xff] }
   0x8   :  { %394 = vmatprep.subr.bf16.mxu0 %v43_v7 }
   0x9   :  { %69 = vperm.xlu1 %419, %v47_v14  }
   0xa   :  { %59 = vperm.xlu0 %418, %v45_v12  }
   0xb   :  { %395 = vmatpush3.bf16.msra.mxu0 %v43_v7 }
   0xe   :  { %397 = vmatmul.mubr.msk.bf16.vlgmr.msra.gmra.mrb[0].mxu0 %vm112_vm0, %v421_v11 }
   0xf   :  { %400 = vmatprep.mubr.msk.bf16.mxu0 %vm112_vm0, %v422_v13 }
  0x10   :  { %14 = vsyncpa [#allocation4], 0  ;;  %74 = vperm.xlu0 %418, %v48_v15   ;;  %v423_v17 = vld [vmem:[%s596_s1 + $0x18] sm:$0xff]   ;;  %v50_v18 = vld [vmem:[%s597_s2 + $0x30] sm:$0xff]  ;;  %79 = vperm.xlu1 %419, %v49_v16   ;;  %vm240_vm1 = vcmask 523264  }
  0x11   :  { %v51_v19 = vld [vmem:[%s597_s2 + $0x38] sm:$0xff]  ;;  %v206_v20 = vld [vmem:[%s599_s4] sm:$0xff]  ;;  %v207_v21 = vld [vmem:[%s599_s4 + $0x8] sm:$0xff] }
  0x12   :  { %v208_v22 = vld [vmem:[%s599_s4 + $0x10] sm:$0xff]  ;;  %v209_v23 = vld [vmem:[%s599_s4 + $0x18] sm:$0xff]  ;;  %v300_v24 = vld [vmem:[%s600_s5] sm:$0xff] }
  0x13   :  { %v301_v25 = vld [vmem:[%s600_s5 + $0x8] sm:$0xff]  ;;  %v302_v26 = vld [vmem:[%s600_s5 + $0x10] sm:$0xff]  ;;  %v303_v27 = vld [vmem:[%s600_s5 + $0x18] sm:$0xff] }
  0x14   :  { %84 = vperm.xlu0 %418, %v50_v18   ;;  %89 = vperm.xlu1 %419, %v51_v19   ;;  %v337_v28 = vld [vmem:[#allocation2] sm:$0x1]  ;;  %v425_v2 = vld [vmem:[%s598_s3 + $0x8] sm:$0xff]  }
  0x15   :  { %v424_v29 = vld [vmem:[%s598_s3] sm:$0xff]   ;;  %s455_s3 = smov [#allocation3]  }
  0x16   :  { %401 = vmatmul.mubr.msk.bf16.gmra.mrb[4].mxu0 %vm112_vm0, %v423_v17  ;;  %412 = vmatprep.mubr.msk.bf16.mxu1 %vm240_vm1, %v424_v29  ;;  %v343_v29 = vlaneseq  ;;  %s360_s24 = sshll.u32 %s455_s3, 4  ;;  %s361_s24 = int_to_ptr.vmem [resolvable:$true] %s360_s24 }
  0x17   :  { %s430_s25 = scalar_lea.vmem %s361_s24, 16  ;;  %s434_s26 = scalar_lea.vmem %s361_s24, 32 }
  0x18   :  { %212 = vperm.xlu0 %418, %v206_v20   ;;  %217 = vperm.xlu1 %419, %v207_v21   ;;  %p431_p0 = scmp.ne.s32.totalorder %s361_s24, %s430_s25  ;;  %p435_p1 = scmp.lt.s32.totalorder %s361_s24, %s361_s24 }
  0x19   :  { %p436_p2 = scmp.lt.s32.totalorder %s434_s26, %s430_s25 }
  0x1b   :  { %p437_p3 = por %p436_p2, %p435_p1 }
  0x1c   :  { %222 = vperm.xlu0 %418, %v208_v22   ;;  %227 = vperm.xlu1 %419, %v209_v23  }
  0x1d   :  { %p438_p4 = pnand %p437_p3, %p431_p0 }
  0x20   :  { %306 = vperm.xlu0 %418, %v300_v24   ;;  %311 = vperm.xlu1 %419, %v301_v25  }
  0x24   :  { %316 = vperm.xlu0 %418, %v302_v26   ;;  %321 = vperm.xlu1 %419, %v303_v27  }
  0x28   :  { %340 = vperm.xlu0 %418, %v337_v28  }
  0x84   :  { %v65_v31 = vpop.permute.xlu1 %64 }
  0x85   :  { %v55_v30 = vpop.permute.xlu0 %54 }
  0x88   :  { %v70_v33 = vpop.permute.xlu1 %69 }
  0x89   :  { %v60_v32 = vpop.permute.xlu0 %59 }
  0x8f   :  { %v75_v37 = vpop.permute.xlu0 %74  ;;  %v80_v42 = vpop.permute.xlu1 %79 }
  0x93   :  { %v85_v49 = vpop.permute.xlu0 %84  ;;  %v90_v54 = vpop.permute.xlu1 %89 }
  0x97   :  { %v213_v3 = vpop.permute.xlu0 %212  ;;  %v218_v4 = vpop.permute.xlu1 %217 }
  0x9b   :  { %v223_v5 = vpop.permute.xlu0 %222  ;;  %v228_v6 = vpop.permute.xlu1 %227 }
  0x9f   :  { %v307_v12 = vpop.permute.xlu0 %306  ;;  %v312_v17 = vpop.permute.xlu1 %311 }
  0xa3   :  { %v317_v23 = vpop.permute.xlu0 %316  ;;  %v322_v26 = vpop.permute.xlu1 %321 }
  0xe1   :  { %v398_v34 = vpop.f32.mrb[0].mxu0 }
  0xe2   :  { %v168_v35 = vadd.f32 %v398_v34, %v65_v31  ;;  %v159_v36 = vpop.f32.mrb[1].mxu0 }
  0xe3   :  { %v160_v38 = vadd.f32 %v159_v36, %v55_v30  ;;  %v399_v39 = vpop.f32.mrb[2].mxu0 }
  0xe4   :  { %v171_v40 = vadd.f32 %v399_v39, %v70_v33  ;;  %v162_v41 = vpop.f32.mrb[3].mxu0  ;;  %v192_v44 = vmax.f32 %v168_v35, 0.0 }
  0xe5   :  { %v163_v43 = vadd.f32 %v162_v41, %v60_v32  ;;  %v190_v46 = vmax.f32 %v160_v38, 0.0  ;;  %v344_v32 = vshrl.u32 %v343_v29, 7 }
  0xe6   :  { %v193_v45 = vmax.f32 %v171_v40, 0.0 }
  0xe7   :  { %v191_v47 = vmax.f32 %v163_v43, 0.0  ;;  %v345_v35 = vsub.s32 0, %v344_v32 }
  0xe8   :  { %v203_v48 = vpack.c.bf16 %v193_v45, %v192_v44 }
  0xe9   :  { %v402_v50 = vpop.f32.mrb[4].mxu0  ;;  %v202_v51 = vpack.c.bf16 %v191_v47, %v190_v46 }
  0xea   :  { %v184_v52 = vadd.f32 %v402_v50, %v85_v49  ;;  %v175_v53 = vpop.f32.mrb[5].mxu0 }
  0xeb   :  { %v176_v55 = vadd.f32 %v175_v53, %v75_v37  ;;  %v403_v56 = vpop.f32.mrb[6].mxu0  ;;  %404 = vmatprep.subr.bf16.mxu1 %v202_v51  ;;  %v341_v37 = vpop.permute.xlu0 %340 }
  0xec   :  { %v187_v57 = vadd.f32 %v403_v56, %v90_v54  ;;  %v178_v58 = vpop.f32.mrb[7].mxu0  ;;  %405 = vmatpush3.bf16.msra.mxu1 %v202_v51  ;;  %v196_v60 = vmax.f32 %v184_v52, 0.0  ;;  %v346_v39 = vrot.slane %v341_v37, %v345_v35 }
  0xed   :  { %v179_v59 = vadd.f32 %v178_v58, %v80_v42  ;;  %406 = vmatprep.subr.bf16.mxu1 %v203_v48  ;;  %v194_v62 = vmax.f32 %v176_v55, 0.0 }
  0xee   :  { %v197_v61 = vmax.f32 %v187_v57, 0.0 }
  0xef   :  { %v195_v63 = vmax.f32 %v179_v59, 0.0 }
  0xf0   :  { %v205_v0 = vpack.c.bf16 %v197_v61, %v196_v60  ;;  %407 = vmatpush3.bf16.msra.mxu1 %v203_v48 }
  0xf1   :  { %v204_v1 = vpack.c.bf16 %v195_v63, %v194_v62 }
  0xf3   :  { %408 = vmatprep.subr.bf16.mxu1 %v204_v1 }
  0xf4   :  { %409 = vmatpush3.bf16.msra.mxu1 %v204_v1 }
  0xf5   :  { %410 = vmatprep.subr.bf16.mxu1 %v205_v0 }
  0xf8   :  { %411 = vmatpush3.bf16.msra.mxu1 %v205_v0 }
  0xfb   :  { %413 = vmatmul.mubr.msk.bf16.vlgmr.msra.gmra.mrb[0].mxu1 %vm240_vm1, %v425_v2 }
 0x1ce   :  { %v414_v7 = vpop.f32.mrb[0].mxu1 }
 0x1cf   :  { %v281_v8 = vpop.f32.mrb[1].mxu1  ;;  %v290_v9 = vadd.f32 %v414_v7, %v223_v5 }
 0x1d0   :  { %v282_v10 = vadd.f32 %v281_v8, %v213_v3  ;;  %v415_v11 = vpop.f32.mrb[2].mxu1 }
 0x1d1   :  { %v284_v13 = vpop.f32.mrb[3].mxu1  ;;  %v293_v15 = vadd.f32 %v415_v11, %v228_v6  ;;  %v298_v18 = vmax.f32 %v290_v9, 0.0 }
 0x1d2   :  { %v296_v14 = vmax.f32 %v282_v10, 0.0  ;;  %v285_v16 = vadd.f32 %v284_v13, %v218_v4 }
 0x1d3   :  { %v299_v21 = vmax.f32 %v293_v15, 0.0  ;;  %v326_v24 = vmul.f32 %v317_v23, %v298_v18 }
 0x1d4   :  { %v297_v19 = vmax.f32 %v285_v16, 0.0  ;;  %v324_v20 = vmul.f32 %v307_v12, %v296_v14 }
 0x1d5   :  { %v327_v27 = vmul.f32 %v322_v26, %v299_v21 }
 0x1d6   :  { %v325_v22 = vmul.f32 %v312_v17, %v297_v19 }
 0x1d8   :  { %v328_v25 = vadd.f32 %v325_v22, %v324_v20 }
 0x1da   :  { %v329_v28 = vadd.f32 %v328_v25, %v326_v24 }
 0x1dc   :  { %v330_v30 = vadd.f32 %v329_v28, %v327_v27 }
 0x1de   :  { %v331_v31 = vrot.slane %v330_v30, 4 }
 0x1e0   :  { %v332_v33 = vadd.f32 %v331_v31, %v330_v30 }
 0x1e2   :  { %v333_v34 = vrot.slane %v332_v33, 2 }
 0x1e4   :  { %v334_v36 = vadd.f32 %v333_v34, %v332_v33 }
 0x1e6   :  { %v335_v38 = vrot.slane %v334_v36, 1 }
 0x1e8   :  { %v336_v40 = vadd.f32 %v335_v38, %v334_v36 }
 0x1ea   :  { %v347_v41 = vadd.f32 %v346_v39, %v336_v40 }
 0x1ec   :  { %v348_v42 = vsub.f32 0.0, %v347_v41 }
 0x1ee   :  { %v349_v43 = vmul.f32 1.442695, %v348_v42 }
 0x1f0   :  { %426 = vpow2.f32 %v349_v43 }
 0x1fa   :  { %v427_v44 = vpop.eup %426 }
 0x1fb   :  { %v351_v45 = vadd.f32 1.0, %v427_v44 }
 0x1fd   :  { %428 = vrcp.f32 %v351_v45 }
 0x207   :  { %v429_v46 = vpop.eup %428 }
 0x208   :  { %353 = vst [vmem:[#allocation3] sm:$0x1] %v429_v46 }
 0x209   :  { %441 = shalt.err (!%p438_p4)
}
 0x20a   :  { %s442_s29 = scalar_lea.hbm %s602_s7, 16 }
 0x20b   :  { %p443_p5 = scmp.ne.s32.totalorder %s602_s7, %s442_s29  ;;  %p446_p6 = scmp.lt.u32.totalorder %s442_s29, %s602_s7 }
 0x20d   :  { %p448_p7 = pnand %p446_p6, %p443_p5 }
 0x20f   :  { %451 = shalt.err (!%p448_p7)
}
 0x210   :  { %363 = dma.vmem_to_hbm [thread:$0]  %s361_s24, 16, %s602_s7, [#allocation4]  }
 0x211   :  { %452 = dma.done.wait [#allocation4], 16  }
 0x212   :  { %453 = vsyncadd [#allocation4], 4294967280 }
 0x213   :  { %367 = vsyncpa [#allocation4], 1 }

</bundles_post_ra>
